<compile_context>
chip_gen: v7x
topology: tpu7x:2x2x1
jax: 0.10.0
libtpu: 0.0.40
codegen_flags: <defaults>
</compile_context>

<pallas_src>
import numpy as np
import jax
import jax.numpy as jnp
from jax.experimental import pallas as pl
from jax.experimental.pallas import tpu as pltpu


COUT_PAD = 128  # lane-dense output width (real Cout=16 is zero-padded)


def c2_kernel(p_ref, w_ref, b_ref, o_ref):
    # p_ref: (4, Mt, K)   w_ref: (K, COUT_PAD)   b_ref: (1, COUT_PAD)
    # o_ref: (Mt, COUT_PAD)
    w = w_ref[...]

    # Conv for each of the 4 positions in the 2x2 pooling window, fused with
    # the pool's running max.  Each dot covers ALL (batch, pooled-position)
    # rows of this tile at once -> 4 big MXU matmuls against a resident weight.
    s = jnp.dot(p_ref[0], w, preferred_element_type=jnp.float32)     # (Mt, 128)
    for t in range(1, 4):                                            # MaxPool2d(2,2)
        s = jnp.maximum(s, jnp.dot(p_ref[t], w,
                                   preferred_element_type=jnp.float32))

    # Bias + ReLU once, after the max (exact: bias is shared across the
    # window and ReLU is monotone).
    out = jnp.maximum(s + b_ref[...].astype(jnp.float32), 0.0)
    o_ref[...] = out.astype(o_ref.dtype)


def _round_up(x, m):
    return (x + m - 1) // m * m


def _im2col_pool4(x_nhwc, KH, KW, Hp, Wp):
    """(N,H,W,Cin) -> (4, N*Hp*Wp, KH*KW*Cin); axis 0 = position in 2x2 pool window."""
    N, H, W, Cin = x_nhwc.shape
    P, Q = Hp * Wp, KH * KW
    di = np.repeat(np.arange(2), 2)               # window-internal row offset
    dj = np.tile(np.arange(2), 2)                 # window-internal col offset
    ii = np.repeat(np.arange(Hp), Wp)             # pooled row
    jj = np.tile(np.arange(Wp), Hp)               # pooled col
    kh = np.repeat(np.arange(KH), KW)             # kernel row
    kw = np.tile(np.arange(KW), KH)               # kernel col
    hidx = 2 * ii[None, :, None] + di[:, None, None] + kh[None, None, :]   # (4,P,Q)
    widx = 2 * jj[None, :, None] + dj[:, None, None] + kw[None, None, :]   # (4,P,Q)
    patches = x_nhwc[:, hidx, widx, :]            # (N, 4, P, Q, Cin)
    patches = patches.reshape(N, 4, P, Q * Cin)   # k = (kh*KW + kw)*Cin + cin
    # 4 outermost, batch folded into the row (M) axis: row = n*P + p
    return jnp.transpose(patches, (1, 0, 2, 3)).reshape(4, N * P, Q * Cin)


def c2_forward(img_nchw, w_oihw, bias):
    """Matches PyTorch C2: Conv2d(6,16,5,valid) -> ReLU -> MaxPool2d(2,2). NCHW in/out."""
    N, Cin, H, W = img_nchw.shape
    Cout, _, KH, KW = w_oihw.shape
    Ho, Wo = H - KH + 1, W - KW + 1
    Hp, Wp = Ho // 2, Wo // 2
    P, K = Hp * Wp, KH * KW * Cin
    M = N * P

    # ----- wrapper-side layout (static gather + transposes) -----
    x_nhwc = jnp.transpose(img_nchw, (0, 2, 3, 1))
    patches = _im2col_pool4(x_nhwc, KH, KW, Hp, Wp)                 # (4, M, K)

    w_mat = jnp.transpose(w_oihw, (2, 3, 1, 0)).reshape(K, Cout)    # (K, Cout)
    w_mat = jnp.pad(w_mat, ((0, 0), (0, COUT_PAD - Cout)))          # (K, 128) lane-dense
    b_mat = jnp.pad(bias.reshape(1, Cout), ((0, 0), (0, COUT_PAD - Cout)))

    # ----- M tiling: one big step at small scale, parallel tiles at batch scale -----
    M_tile = min(1024, _round_up(M, 8))           # sublane-aligned tile
    M_pad = _round_up(M, M_tile)
    if M_pad != M:
        patches = jnp.pad(patches, ((0, 0), (0, M_pad - M), (0, 0)))
    num_tiles = M_pad // M_tile
    # Per-step VMEM: 4*M_tile*K*4B (~2.4 MiB) double-buffered + weight/bias/out
    # tiles — comfortably inside the default scoped-VMEM limit on all chips.

    out = pl.pallas_call(
        c2_kernel,
        out_shape=jax.ShapeDtypeStruct((M_pad, COUT_PAD), img_nchw.dtype),
        grid_spec=pltpu.PrefetchScalarGridSpec(
            num_scalar_prefetch=0,
            grid=(num_tiles,),
            in_specs=[
                pl.BlockSpec((4, M_tile, K), lambda i: (0, i, 0)),
                pl.BlockSpec((K, COUT_PAD), lambda i: (0, 0)),
                pl.BlockSpec((1, COUT_PAD), lambda i: (0, 0)),
            ],
            out_specs=pl.BlockSpec((M_tile, COUT_PAD), lambda i: (i, 0)),
        ),
        compiler_params=pltpu.CompilerParams(
            dimension_semantics=("parallel",)),
    )(patches, w_mat, b_mat)

    out = out[:M, :Cout].reshape(N, Hp, Wp, Cout)                   # drop padding
    return jnp.transpose(out, (0, 3, 1, 2))       # back to NCHW


def _reference(img, w, b):
    y = jax.lax.conv_general_dilated(
        img, w, window_strides=(1, 1), padding="VALID",
        dimension_numbers=("NCHW", "OIHW", "NCHW"))
    y = jnp.maximum(y + b.reshape(1, -1, 1, 1), 0.0)
    return jax.lax.reduce_window(
        y, -jnp.inf, jax.lax.max,
        window_dimensions=(1, 1, 2, 2), window_strides=(1, 1, 2, 2),
        padding="VALID")


if __name__ == "__main__":
    key = jax.random.PRNGKey(0)
    k_x, k_w, k_b = jax.random.split(key, 3)

    # Classic LeNet C2 input: (N, 6, 14, 14) -> conv (N,16,10,10) -> pool (N,16,5,5)
    N, Cin, H, W = 2, 6, 14, 14
    Cout, KH, KW = 16, 5, 5

    img = jax.random.normal(k_x, (N, Cin, H, W), dtype=jnp.float32)
    fan_in = Cin * KH * KW
    bound = 1.0 / float(np.sqrt(fan_in))          # PyTorch default Conv2d init range
    w = jax.random.uniform(k_w, (Cout, Cin, KH, KW), jnp.float32, -bound, bound)
    b = jax.random.uniform(k_b, (Cout,), jnp.float32, -bound, bound)

    out = jax.block_until_ready(c2_forward(img, w, b))

    ref = _reference(img, w, b)
    assert out.shape == (N, Cout, 5, 5), out.shape
    assert jnp.allclose(out, ref, atol=1e-4, rtol=1e-4), float(
        jnp.max(jnp.abs(out - ref)))
    print("KERNEL_OK")
</pallas_src>

<mosaic_0001>
module attributes {stable_mosaic.version = 11 : i64} {
  func.func @c2_kernel(%arg0: i32, %arg1: memref<4x56x150xf32, #tpu.memory_space<vmem>>, %arg2: memref<150x128xf32, #tpu.memory_space<vmem>>, %arg3: memref<1x128xf32, #tpu.memory_space<vmem>>, %arg4: memref<56x128xf32, #tpu.memory_space<vmem>>) attributes {dimension_semantics = [#tpu.dimension_semantics<parallel>], iteration_bounds = array<i64: 1>, scalar_prefetch = 0 : i64, scratch_operands = 0 : i64, tpu.core_type = #tpu.core_type<tc>, window_params = [{transform_indices = @transform_0, window_bounds = array<i64: 4, 56, 150>}, {pipeline_mode = #tpu.pipeline_mode<synchronous>, transform_indices = @transform_1, window_bounds = array<i64: 150, 128>}, {pipeline_mode = #tpu.pipeline_mode<synchronous>, transform_indices = @transform_2, window_bounds = array<i64: 1, 128>}, {transform_indices = @transform_3, window_bounds = array<i64: 56, 128>}]} {
    %c0 = arith.constant 0 : index
    %c0_0 = arith.constant 0 : index
    %0 = vector.load %arg2[%c0, %c0_0] : memref<150x128xf32, #tpu.memory_space<vmem>>, vector<150x128xf32>
    %c0_1 = arith.constant 0 : index
    %c0_2 = arith.constant 0 : index
    %c0_3 = arith.constant 0 : index
    %1 = vector.load %arg1[%c0_1, %c0_2, %c0_3] : memref<4x56x150xf32, #tpu.memory_space<vmem>>, vector<1x56x150xf32>
    %2 = vector.shape_cast %1 : vector<1x56x150xf32> to vector<56x150xf32>
    %cst = arith.constant dense<0.000000e+00> : vector<56x128xf32>
    %3 = tpu.matmul %2, %0, %cst {dimension_numbers = #tpu.dot_dimension_numbers<[1], [0], [0], [1], [0, 0, 1, 1], [], []>} : vector<56x150xf32>, vector<150x128xf32>, vector<56x128xf32> -> vector<56x128xf32>
    %c1 = arith.constant 1 : index
    %c0_4 = arith.constant 0 : index
    %c0_5 = arith.constant 0 : index
    %4 = vector.load %arg1[%c1, %c0_4, %c0_5] : memref<4x56x150xf32, #tpu.memory_space<vmem>>, vector<1x56x150xf32>
    %5 = vector.shape_cast %4 : vector<1x56x150xf32> to vector<56x150xf32>
    %cst_6 = arith.constant dense<0.000000e+00> : vector<56x128xf32>
    %6 = tpu.matmul %5, %0, %cst_6 {dimension_numbers = #tpu.dot_dimension_numbers<[1], [0], [0], [1], [0, 0, 1, 1], [], []>} : vector<56x150xf32>, vector<150x128xf32>, vector<56x128xf32> -> vector<56x128xf32>
    %7 = arith.maximumf %3, %6 : vector<56x128xf32>
    %c2 = arith.constant 2 : index
    %c0_7 = arith.constant 0 : index
    %c0_8 = arith.constant 0 : index
    %8 = vector.load %arg1[%c2, %c0_7, %c0_8] : memref<4x56x150xf32, #tpu.memory_space<vmem>>, vector<1x56x150xf32>
    %9 = vector.shape_cast %8 : vector<1x56x150xf32> to vector<56x150xf32>
    %cst_9 = arith.constant dense<0.000000e+00> : vector<56x128xf32>
    %10 = tpu.matmul %9, %0, %cst_9 {dimension_numbers = #tpu.dot_dimension_numbers<[1], [0], [0], [1], [0, 0, 1, 1], [], []>} : vector<56x150xf32>, vector<150x128xf32>, vector<56x128xf32> -> vector<56x128xf32>
    %11 = arith.maximumf %7, %10 : vector<56x128xf32>
    %c3 = arith.constant 3 : index
    %c0_10 = arith.constant 0 : index
    %c0_11 = arith.constant 0 : index
    %12 = vector.load %arg1[%c3, %c0_10, %c0_11] : memref<4x56x150xf32, #tpu.memory_space<vmem>>, vector<1x56x150xf32>
    %13 = vector.shape_cast %12 : vector<1x56x150xf32> to vector<56x150xf32>
    %cst_12 = arith.constant dense<0.000000e+00> : vector<56x128xf32>
    %14 = tpu.matmul %13, %0, %cst_12 {dimension_numbers = #tpu.dot_dimension_numbers<[1], [0], [0], [1], [0, 0, 1, 1], [], []>} : vector<56x150xf32>, vector<150x128xf32>, vector<56x128xf32> -> vector<56x128xf32>
    %15 = arith.maximumf %11, %14 : vector<56x128xf32>
    %c0_13 = arith.constant 0 : index
    %c0_14 = arith.constant 0 : index
    %16 = vector.load %arg3[%c0_13, %c0_14] : memref<1x128xf32, #tpu.memory_space<vmem>>, vector<1x128xf32>
    %17 = vector.broadcast %16 : vector<1x128xf32> to vector<56x128xf32>
    %18 = arith.addf %15, %17 : vector<56x128xf32>
    %cst_15 = arith.constant 0.000000e+00 : f32
    %19 = vector.broadcast %cst_15 : f32 to vector<56x128xf32>
    %20 = arith.maximumf %18, %19 : vector<56x128xf32>
    %c0_16 = arith.constant 0 : index
    %c0_17 = arith.constant 0 : index
    %21 = vector.load %arg4[%c0_16, %c0_17] : memref<56x128xf32, #tpu.memory_space<vmem>>, vector<56x128xf32>
    tpu.vector_store %arg4[%c0_16, %c0_17], %20 {strides = array<i32>} : memref<56x128xf32, #tpu.memory_space<vmem>>, vector<56x128xf32>,
    return
  }
  func.func @transform_0(%arg0: i32) -> (i32, i32, i32) {
    %c0_i32 = arith.constant 0 : i32
    %c0_i32_0 = arith.constant 0 : i32
    %c0_i32_1 = arith.constant 0 : i32
    return %c0_i32, %arg0, %c0_i32_0 : i32, i32, i32
  }
  func.func @transform_1(%arg0: i32) -> (i32, i32) {
    %c0_i32 = arith.constant 0 : i32
    %c0_i32_0 = arith.constant 0 : i32
    %c0_i32_1 = arith.constant 0 : i32
    return %c0_i32, %c0_i32_0 : i32, i32
  }
  func.func @transform_2(%arg0: i32) -> (i32, i32) {
    %c0_i32 = arith.constant 0 : i32
    %c0_i32_0 = arith.constant 0 : i32
    %c0_i32_1 = arith.constant 0 : i32
    return %c0_i32, %c0_i32_0 : i32, i32
  }
  func.func @transform_3(%arg0: i32) -> (i32, i32) {
    %c0_i32 = arith.constant 0 : i32
    %c0_i32_0 = arith.constant 0 : i32
    return %arg0, %c0_i32 : i32, i32
  }
}

</mosaic_0001>

<bundles_post_ra>
// kernel: tpu_custom_call.1
= control target key start
LH: loop header
LB: loop body
LE: loop exit
PB: predicated region body
PF: predicated region fallthrough
CT: control target
= control target key end

     0   :  { %8 = vsyncpa [#allocation3], 0  ;;  %s1105_s0 = inlined_call_operand.hbm [shape: f32[4,56,150], index: 0, kind: input, shape index: {}]   ;;  %s1106_s1 = inlined_call_operand.hbm [shape: f32[150,128], index: 1, kind: input, shape index: {}]   ;;  %s1107_s2 = inlined_call_operand.vmem [shape: f32[1,128], index: 2, kind: input, shape index: {}]   ;;  %s1108_s3 = inlined_call_operand.hbm [shape: f32[56,128], index: 3, kind: output, shape index: {}]  }
   0x1   :  { %9 = vsyncpa [#allocation6], 0 }
   0x2   :  { %10 = vsyncpa [#allocation4], 0  ;;  %s899_s12 = smov [#allocation2]   ;;  %s827_s16 = scalar_lea.hbm %s1105_s0, 7168 }
   0x3   :  { %s16_s13 = sshll.u32 %s899_s12, 4  ;;  %p828_p0 = scmp.ne.s32.totalorder %s1105_s0, %s827_s16  ;;  %s17_s13 = int_to_ptr.vmem [resolvable:$true] %s16_s13 }
   0x4   :  { %p831_p1 = scmp.lt.u32.totalorder %s827_s16, %s1105_s0 }
   0x6   :  { %p833_p2 = pnand %p831_p1, %p828_p0 }
   0x8   :  { %836 = shalt.err (!%p833_p2)
}
   0x9   :  { %s837_s21 = scalar_lea.vmem %s17_s13, 7168  ;;  %p842_p4 = scmp.lt.s32.totalorder %s17_s13, %s17_s13 }
   0xa   :  { %p838_p3 = scmp.ne.s32.totalorder %s17_s13, %s837_s21  ;;  %p843_p5 = scmp.lt.s32.totalorder %s837_s21, %s837_s21 }
   0xc   :  { %p844_p6 = por %p843_p5, %p842_p4 }
   0xe   :  { %p845_p7 = pnand %p844_p6, %p838_p3 }
  0x10   :  { %848 = shalt.err (!%p845_p7)
}
  0x11   :  { %s900_s22 = smov 256   ;;  %s901_s23 = smov 16  }
  0x12   :  { %22 = dma.hbm_to_vmem [thread:$0]  %s1105_s0, 7168, %s17_s13, [#allocation3], %s900_s22, %s900_s22, %s901_s23  }
  0x13   :  { %s902_s26 = smov [#allocation5]   ;;  %s849_s30 = scalar_lea.hbm %s1106_s1, 2432 }
  0x14   :  { %s28_s27 = sshll.u32 %s902_s26, 4  ;;  %p850_p8 = scmp.ne.s32.totalorder %s1106_s1, %s849_s30  ;;  %s29_s27 = int_to_ptr.vmem [resolvable:$true] %s28_s27 }
  0x15   :  { %p853_p9 = scmp.lt.u32.totalorder %s849_s30, %s1106_s1 }
  0x17   :  { %p855_p10 = pnand %p853_p9, %p850_p8 }
  0x19   :  { %858 = shalt.err (!%p855_p10)
}
  0x1a   :  { %s859_s8 = scalar_lea.vmem %s29_s27, 2432  ;;  %p864_p12 = scmp.lt.s32.totalorder %s29_s27, %s29_s27 }
  0x1b   :  { %p860_p11 = scmp.ne.s32.totalorder %s29_s27, %s859_s8  ;;  %p865_p13 = scmp.lt.s32.totalorder %s859_s8, %s859_s8 }
  0x1d   :  { %p866_p0 = por %p865_p13, %p864_p12 }
  0x1f   :  { %p867_p1 = pnand %p866_p0, %p860_p11 }
  0x21   :  { %870 = shalt.err (!%p867_p1)
}
  0x22   :  { %s903_s0 = smov 128   ;;  %s904_s9 = smov 8  }
  0x23   :  { %34 = dma.hbm_to_vmem [thread:$0]  %s1106_s1, 2432, %s29_s27, [#allocation6], %s903_s0, %s903_s0, %s904_s9  }
  0x24   :  { %893 = dma.done.wait [#allocation3], 7168  }
  0x25   :  { %894 = vsyncadd [#allocation3], 4294960128 }
  0x26   :  { %895 = dma.done.wait [#allocation6], 2432  }
  0x27   :  { %896 = vsyncadd [#allocation6], 4294964864  ;;  %v905_v0 = vmov 0.0|0.0   ;;  %v43_v1 = vld [vmem:[#allocation5] sm:$0xff]  ;;  %v44_v2 = vld [vmem:[#allocation5 + $0x8] sm:$0xff]  ;;  %vm76_vm0 = vcmask 179200  }
  0x28   :  { %710 = vmatprep.subr.bf16.mxu0 %v905_v0  ;;  %737 = vmatprep.subr.bf16.mxu1 %v905_v0  ;;  %v45_v3 = vld [vmem:[#allocation5 + $0x10] sm:$0xff]  ;;  %v957_v4 = vpack.c.bf16 %v44_v2, %v43_v1  ;;  %v46_v5 = vld [vmem:[#allocation5 + $0x18] sm:$0xff]  ;;  %v47_v7 = vld [vmem:[#allocation5 + $0x20] sm:$0xff]  ;;  %v906_v30 = vmov 0.0   ;;  %vm98_vm1 = vcmask 1045504  }
  0x29   :  { %v961_v6 = vpack.c.bf16 %v46_v5, %v45_v3  ;;  %v48_v8 = vld [vmem:[#allocation5 + $0x28] sm:$0xff]  ;;  %v204_v11 = vld [vmem:[#allocation2 + $0x78] sm:$0xff]  ;;  %v49_v12 = vld [vmem:[#allocation5 + $0x30] sm:$0xff] }
  0x2a   :  { %712 = vmatpush1.bf16.msra.mxu0 %v957_v4  ;;  %739 = vmatpush1.bf16.msra.mxu1 %v957_v4  ;;  %v63_v9 = vld [vmem:[#allocation2 + $0x8] sm:$0xff]  ;;  %v967_v10 = vpack.c.bf16 %v48_v8, %v47_v7  ;;  %v50_v13 = vld [vmem:[#allocation5 + $0x38] sm:$0xff]  ;;  %v51_v15 = vld [vmem:[#allocation5 + $0x40] sm:$0xff] }
  0x2b   :  { %713 = vmatprep.subr.bf16.mxu0 %v905_v0  ;;  %740 = vmatprep.subr.bf16.mxu1 %v905_v0  ;;  %v975_v14 = vpack.c.bf16 %v50_v13, %v49_v12  ;;  %v52_v16 = vld [vmem:[#allocation5 + $0x48] sm:$0xff]  ;;  %v53_v18 = vld [vmem:[#allocation5 + $0x50] sm:$0xff]  ;;  %v54_v19 = vld [vmem:[#allocation5 + $0x58] sm:$0xff] }
  0x2c   :  { %678 = vmatprep.mubr.msk.f32.mxu0 %vm76_vm0, %v63_v9  ;;  %686 = vmatprep.mubr.msk.f32.mxu1 %vm76_vm0, %v204_v11  ;;  %v981_v17 = vpack.c.bf16 %v52_v16, %v51_v15  ;;  %v987_v20 = vpack.c.bf16 %v54_v19, %v53_v18  ;;  %v55_v21 = vld [vmem:[#allocation5 + $0x60] sm:$0xff]  ;;  %v56_v22 = vld [vmem:[#allocation5 + $0x68] sm:$0xff]  ;;  %v57_v24 = vld [vmem:[#allocation5 + $0x70] sm:$0xff] }
  0x2d   :  { %v993_v23 = vpack.c.bf16 %v56_v22, %v55_v21  ;;  %v58_v25 = vld [vmem:[#allocation5 + $0x78] sm:$0xff]  ;;  %v59_v27 = vld [vmem:[#allocation5 + $0x80] sm:$0xff]  ;;  %v60_v28 = vld [vmem:[#allocation5 + $0x88] sm:$0xff] }
  0x2e   :  { %715 = vmatpush1.bf16.msra.mxu0 %v961_v6  ;;  %742 = vmatpush1.bf16.msra.mxu1 %v961_v6  ;;  %v999_v26 = vpack.c.bf16 %v58_v25, %v57_v24  ;;  %v1005_v29 = vpack.c.bf16 %v60_v28, %v59_v27  ;;  %v1012_v31 = vld [vmem:[#allocation5 + $0x90] sm:$0x3f]  ;;  %v62_v32 = vld [vmem:[#allocation2] sm:$0xff]  ;;  %v65_v34 = vld [vmem:[#allocation2 + $0x18] sm:$0xff] }
  0x2f   :  { %716 = vmatprep.subr.bf16.mxu0 %v905_v0  ;;  %743 = vmatprep.subr.bf16.mxu1 %v905_v0  ;;  %v203_v33 = vld [vmem:[#allocation2 + $0x70] sm:$0xff]  ;;  %v206_v36 = vld [vmem:[#allocation2 + $0x88] sm:$0xff]  ;;  %v205_v37 = vld [vmem:[#allocation2 + $0x80] sm:$0xff] }
  0x30   :  { %v64_v35 = vld [vmem:[#allocation2 + $0x10] sm:$0xff]  ;;  %v67_v38 = vld [vmem:[#allocation2 + $0x28] sm:$0xff]  ;;  %v66_v39 = vld [vmem:[#allocation2 + $0x20] sm:$0xff] }
  0x31   :  { %v208_v40 = vld [vmem:[#allocation2 + $0x98] sm:$0xff]  ;;  %v207_v41 = vld [vmem:[#allocation2 + $0x90] sm:$0xff]  ;;  %v210_v44 = vld [vmem:[#allocation2 + $0xa8] sm:$0xff] }
  0x32   :  { %718 = vmatpush1.bf16.msra.mxu0 %v967_v10  ;;  %745 = vmatpush1.bf16.msra.mxu1 %v967_v10  ;;  %v69_v42 = vld [vmem:[#allocation2 + $0x38] sm:$0xff]  ;;  %v68_v43 = vld [vmem:[#allocation2 + $0x30] sm:$0xff]  ;;  %v209_v45 = vld [vmem:[#allocation2 + $0xa0] sm:$0xff] }
  0x33   :  { %719 = vmatprep.subr.bf16.mxu0 %v905_v0  ;;  %746 = vmatprep.subr.bf16.mxu1 %v905_v0  ;;  %v71_v46 = vld [vmem:[#allocation2 + $0x48] sm:$0xff]  ;;  %v70_v47 = vld [vmem:[#allocation2 + $0x40] sm:$0xff]  ;;  %v212_v48 = vld [vmem:[#allocation2 + $0xb8] sm:$0xff] }
  0x34   :  { %v211_v49 = vld [vmem:[#allocation2 + $0xb0] sm:$0xff]  ;;  %v73_v50 = vld [vmem:[#allocation2 + $0x58] sm:$0xff]  ;;  %v214_v52 = vld [vmem:[#allocation2 + $0xc8] sm:$0xff] }
  0x35   :  { %v72_v51 = vld [vmem:[#allocation2 + $0x50] sm:$0xff]  ;;  %v213_v53 = vld [vmem:[#allocation2 + $0xc0] sm:$0xff]  ;;  %v75_v54 = vld [vmem:[#allocation2 + $0x68] sm:$0xff] }
  0x36   :  { %721 = vmatpush1.bf16.msra.mxu0 %v975_v14  ;;  %748 = vmatpush1.bf16.msra.mxu1 %v975_v14  ;;  %v74_v55 = vld [vmem:[#allocation2 + $0x60] sm:$0xff]  ;;  %v216_v56 = vld [vmem:[#allocation2 + $0xd8] sm:$0xff]  ;;  %v215_v57 = vld [vmem:[#allocation2 + $0xd0] sm:$0xff] }
  0x37   :  { %722 = vmatprep.subr.bf16.mxu0 %v905_v0  ;;  %749 = vmatprep.subr.bf16.mxu1 %v905_v0  ;;  %v347_v58 = vld [vmem:[#allocation2 + $0xe8] sm:$0xff]  ;;  %v490_v59 = vld [vmem:[#allocation2 + $0x158] sm:$0xff]  ;;  %v346_v60 = vld [vmem:[#allocation2 + $0xe0] sm:$0xff] }
  0x38   :  { %v349_v61 = vld [vmem:[#allocation2 + $0xf8] sm:$0xff]  ;;  %v489_v62 = vld [vmem:[#allocation2 + $0x150] sm:$0xff]  ;;  %v492_v63 = vld [vmem:[#allocation2 + $0x168] sm:$0xff] }
  0x39   :  { %v351_v1 = vld [vmem:[#allocation2 + $0x108] sm:$0xff]  ;;  %v491_v2 = vld [vmem:[#allocation2 + $0x160] sm:$0xff]  ;;  %v494_v3 = vld [vmem:[#allocation2 + $0x178] sm:$0xff] }
  0x3a   :  { %724 = vmatpush1.bf16.msra.mxu0 %v981_v17  ;;  %751 = vmatpush1.bf16.msra.mxu1 %v981_v17  ;;  %v353_v5 = vld [vmem:[#allocation2 + $0x118] sm:$0xff]  ;;  %v496_v7 = vld [vmem:[#allocation2 + $0x188] sm:$0xff]  ;;  %v352_v8 = vld [vmem:[#allocation2 + $0x110] sm:$0xff] }
  0x3b   :  { %725 = vmatprep.subr.bf16.mxu0 %v905_v0  ;;  %752 = vmatprep.subr.bf16.mxu1 %v905_v0  ;;  %v355_v9 = vld [vmem:[#allocation2 + $0x128] sm:$0xff]  ;;  %v498_v11 = vld [vmem:[#allocation2 + $0x198] sm:$0xff]  ;;  %v354_v12 = vld [vmem:[#allocation2 + $0x120] sm:$0xff] }
  0x3c   :  { %v357_v13 = vld [vmem:[#allocation2 + $0x138] sm:$0xff]  ;;  %v500_v15 = vld [vmem:[#allocation2 + $0x1a8] sm:$0xff]  ;;  %v356_v16 = vld [vmem:[#allocation2 + $0x130] sm:$0xff] }
  0x3d   :  { %v499_v18 = vld [vmem:[#allocation2 + $0x1a0] sm:$0xff]  ;;  %v502_v19 = vld [vmem:[#allocation2 + $0x1b8] sm:$0xff]  ;;  %v501_v21 = vld [vmem:[#allocation2 + $0x1b0] sm:$0xff] }
  0x3e   :  { %727 = vmatpush1.bf16.msra.mxu0 %v987_v20  ;;  %754 = vmatpush1.bf16.msra.mxu1 %v987_v20 }
  0x3f   :  { %728 = vmatprep.subr.bf16.mxu0 %v905_v0  ;;  %755 = vmatprep.subr.bf16.mxu1 %v905_v0 }
  0x42   :  { %730 = vmatpush1.bf16.msra.mxu0 %v993_v23  ;;  %757 = vmatpush1.bf16.msra.mxu1 %v993_v23 }
  0x43   :  { %731 = vmatprep.subr.bf16.mxu0 %v905_v0  ;;  %758 = vmatprep.subr.bf16.mxu1 %v905_v0 }
  0x46   :  { %733 = vmatpush1.bf16.msra.mxu0 %v999_v26  ;;  %760 = vmatpush1.bf16.msra.mxu1 %v999_v26 }
  0x47   :  { %734 = vmatprep.subr.bf16.mxu0 %v905_v0  ;;  %761 = vmatprep.subr.bf16.mxu1 %v905_v0 }
  0x4a   :  { %736 = vmatpush1.bf16.msra.mxu0 %v1005_v29  ;;  %763 = vmatpush1.bf16.msra.mxu1 %v1005_v29 }
  0x4b   :  { %138 = vmatprep.subr.mxu0 %v906_v30  ;;  %274 = vmatprep.subr.mxu1 %v906_v30 }
  0x4e   :  { %677 = vmatpush1.msk.msra.mxu0 %vm98_vm1, %v1012_v31  ;;  %685 = vmatpush1.msk.msra.mxu1 %vm98_vm1, %v1012_v31 }
  0x4f   :  { %167 = vmatmul.mubr.f32.vlgmr.msra.gmra.mrb[0].mxu0 %v62_v32  ;;  %764 = vmatprep.subr.bf16.mxu0 %v905_v0 }
  0x50   :  { %303 = vmatmul.mubr.f32.vlgmr.msra.gmra.mrb[0].mxu1 %v203_v33  ;;  %766 = vmatpush1.bf16.msra.mxu0 %v957_v4 }
  0x51   :  { %791 = vmatprep.subr.bf16.mxu1 %v905_v0  ;;  %767 = vmatprep.subr.bf16.mxu0 %v905_v0 }
  0x52   :  { %793 = vmatpush1.bf16.msra.mxu1 %v957_v4  ;;  %679 = vmatprep.mubr.msk.f32.mxu0 %vm76_vm0, %v65_v34  ;;  %v350_v4 = vld [vmem:[#allocation2 + $0x100] sm:$0xff] }
  0x53   :  { %794 = vmatprep.subr.bf16.mxu1 %v905_v0  ;;  %172 = vmatmul.mubr.f32.gmra.mrb[2].mxu0 %v64_v35 }
  0x54   :  { %769 = vmatpush1.bf16.msra.mxu0 %v961_v6  ;;  %687 = vmatprep.mubr.msk.f32.mxu1 %vm76_vm0, %v206_v36 }
  0x55   :  { %770 = vmatprep.subr.bf16.mxu0 %v905_v0  ;;  %308 = vmatmul.mubr.f32.gmra.mrb[2].mxu1 %v205_v37 }
  0x56   :  { %796 = vmatpush1.bf16.msra.mxu1 %v961_v6  ;;  %680 = vmatprep.mubr.msk.f32.mxu0 %vm76_vm0, %v67_v38  ;;  %v493_v6 = vld [vmem:[#allocation2 + $0x170] sm:$0xff] }
  0x57   :  { %797 = vmatprep.subr.bf16.mxu1 %v905_v0  ;;  %177 = vmatmul.mubr.f32.gmra.mrb[4].mxu0 %v66_v39 }
  0x58   :  { %772 = vmatpush1.bf16.msra.mxu0 %v967_v10  ;;  %688 = vmatprep.mubr.msk.f32.mxu1 %vm76_vm0, %v208_v40 }
  0x59   :  { %773 = vmatprep.subr.bf16.mxu0 %v905_v0  ;;  %313 = vmatmul.mubr.f32.gmra.mrb[4].mxu1 %v207_v41 }
  0x5a   :  { %799 = vmatpush1.bf16.msra.mxu1 %v967_v10  ;;  %681 = vmatprep.mubr.msk.f32.mxu0 %vm76_vm0, %v69_v42  ;;  %v495_v10 = vld [vmem:[#allocation2 + $0x180] sm:$0xff] }
  0x5b   :  { %800 = vmatprep.subr.bf16.mxu1 %v905_v0  ;;  %182 = vmatmul.mubr.f32.gmra.mrb[6].mxu0 %v68_v43 }
  0x5c   :  { %775 = vmatpush1.bf16.msra.mxu0 %v975_v14  ;;  %689 = vmatprep.mubr.msk.f32.mxu1 %vm76_vm0, %v210_v44 }
  0x5d   :  { %776 = vmatprep.subr.bf16.mxu0 %v905_v0  ;;  %318 = vmatmul.mubr.f32.gmra.mrb[6].mxu1 %v209_v45 }
  0x5e   :  { %802 = vmatpush1.bf16.msra.mxu1 %v975_v14  ;;  %682 = vmatprep.mubr.msk.f32.mxu0 %vm76_vm0, %v71_v46  ;;  %v497_v14 = vld [vmem:[#allocation2 + $0x190] sm:$0xff] }
  0x5f   :  { %803 = vmatprep.subr.bf16.mxu1 %v905_v0  ;;  %187 = vmatmul.mubr.f32.gmra.mrb[8].mxu0 %v70_v47 }
  0x60   :  { %778 = vmatpush1.bf16.msra.mxu0 %v981_v17  ;;  %690 = vmatprep.mubr.msk.f32.mxu1 %vm76_vm0, %v212_v48 }
  0x61   :  { %779 = vmatprep.subr.bf16.mxu0 %v905_v0  ;;  %323 = vmatmul.mubr.f32.gmra.mrb[8].mxu1 %v211_v49 }
  0x62   :  { %805 = vmatpush1.bf16.msra.mxu1 %v981_v17  ;;  %683 = vmatprep.mubr.msk.f32.mxu0 %vm76_vm0, %v73_v50  ;;  %v359_v17 = vld [vmem:[#allocation2 + $0x148] sm:$0xff] }
  0x63   :  { %806 = vmatprep.subr.bf16.mxu1 %v905_v0  ;;  %192 = vmatmul.mubr.f32.gmra.mrb[10].mxu0 %v72_v51 }
  0x64   :  { %781 = vmatpush1.bf16.msra.mxu0 %v987_v20  ;;  %691 = vmatprep.mubr.msk.f32.mxu1 %vm76_vm0, %v214_v52 }
  0x65   :  { %782 = vmatprep.subr.bf16.mxu0 %v905_v0  ;;  %328 = vmatmul.mubr.f32.gmra.mrb[10].mxu1 %v213_v53 }
  0x66   :  { %808 = vmatpush1.bf16.msra.mxu1 %v987_v20  ;;  %684 = vmatprep.mubr.msk.f32.mxu0 %vm76_vm0, %v75_v54  ;;  %v358_v20 = vld [vmem:[#allocation2 + $0x140] sm:$0xff] }
  0x67   :  { %809 = vmatprep.subr.bf16.mxu1 %v905_v0  ;;  %197 = vmatmul.mubr.f32.gmra.mrb[12].mxu0 %v74_v55 }
  0x68   :  { %784 = vmatpush1.bf16.msra.mxu0 %v993_v23  ;;  %692 = vmatprep.mubr.msk.f32.mxu1 %vm76_vm0, %v216_v56 }
  0x69   :  { %785 = vmatprep.subr.bf16.mxu0 %v905_v0  ;;  %333 = vmatmul.mubr.f32.gmra.mrb[12].mxu1 %v215_v57 }
  0x6a   :  { %811 = vmatpush1.bf16.msra.mxu1 %v993_v23  ;;  %694 = vmatprep.mubr.msk.f32.mxu0 %vm76_vm0, %v347_v58 }
  0x6b   :  { %812 = vmatprep.subr.bf16.mxu1 %v905_v0  ;;  %702 = vmatprep.mubr.msk.f32.mxu1 %vm76_vm0, %v490_v59 }
  0x6c   :  { %787 = vmatpush1.bf16.msra.mxu0 %v999_v26 }
  0x6d   :  { %788 = vmatprep.subr.bf16.mxu0 %v905_v0 }
  0x6e   :  { %814 = vmatpush1.bf16.msra.mxu1 %v999_v26 }
  0x6f   :  { %815 = vmatprep.subr.bf16.mxu1 %v905_v0  ;;  %v348_v0 = vld [vmem:[#allocation2 + $0xf0] sm:$0xff] }
  0x70   :  { %790 = vmatpush1.bf16.msra.mxu0 %v1005_v29 }
  0x71   :  { %417 = vmatprep.subr.mxu0 %v906_v30 }
  0x72   :  { %817 = vmatpush1.bf16.msra.mxu1 %v1005_v29 }
  0x73   :  { %560 = vmatprep.subr.mxu1 %v906_v30 }
  0x74   :  { %693 = vmatpush1.msk.msra.mxu0 %vm98_vm1, %v1012_v31 }
  0x75   :  { %446 = vmatmul.mubr.f32.vlgmr.msra.gmra.mrb[14].mxu0 %v346_v60 }
  0x76   :  { %701 = vmatpush1.msk.msra.mxu1 %vm98_vm1, %v1012_v31  ;;  %695 = vmatprep.mubr.msk.f32.mxu0 %vm76_vm0, %v349_v61  ;;  %v709_v61 = vld [vmem:[%s1107_s2] ss:$0 sm:$0xff]  ;;  %s907_s2 = smov [#allocation7]  }
  0x77   :  { %589 = vmatmul.mubr.f32.vlgmr.msra.gmra.mrb[14].mxu1 %v489_v62  ;;  %s664_s13 = sshll.u32 %s907_s2, 4  ;;  %s665_s13 = int_to_ptr.vmem [resolvable:$true] %s664_s13 }
  0x78   :  { %703 = vmatprep.mubr.msk.f32.mxu1 %vm76_vm0, %v492_v63  ;;  %s871_s14 = scalar_lea.vmem %s665_s13, 896  ;;  %p876_p3 = scmp.lt.s32.totalorder %s665_s13, %s665_s13 }
  0x79   :  { %451 = vmatmul.mubr.f32.gmra.mrb[16].mxu0 %v348_v0  ;;  %p872_p2 = scmp.ne.s32.totalorder %s665_s13, %s871_s14  ;;  %p877_p4 = scmp.lt.s32.totalorder %s871_s14, %s871_s14 }
  0x7a   :  { %696 = vmatprep.mubr.msk.f32.mxu0 %vm76_vm0, %v351_v1 }
  0x7b   :  { %594 = vmatmul.mubr.f32.gmra.mrb[16].mxu1 %v491_v2  ;;  %p878_p5 = por %p877_p4, %p876_p3 }
  0x7c   :  { %704 = vmatprep.mubr.msk.f32.mxu1 %vm76_vm0, %v494_v3 }
  0x7d   :  { %456 = vmatmul.mubr.f32.gmra.mrb[18].mxu0 %v350_v4  ;;  %p879_p6 = pnand %p878_p5, %p872_p2 }
  0x7e   :  { %697 = vmatprep.mubr.msk.f32.mxu0 %vm76_vm0, %v353_v5 }
  0x7f   :  { %599 = vmatmul.mubr.f32.gmra.mrb[18].mxu1 %v493_v6 }
  0x80   :  { %705 = vmatprep.mubr.msk.f32.mxu1 %vm76_vm0, %v496_v7 }
  0x81   :  { %461 = vmatmul.mubr.f32.gmra.mrb[20].mxu0 %v352_v8 }
  0x82   :  { %698 = vmatprep.mubr.msk.f32.mxu0 %vm76_vm0, %v355_v9 }
  0x83   :  { %604 = vmatmul.mubr.f32.gmra.mrb[20].mxu1 %v495_v10 }
  0x84   :  { %706 = vmatprep.mubr.msk.f32.mxu1 %vm76_vm0, %v498_v11 }
  0x85   :  { %466 = vmatmul.mubr.f32.gmra.mrb[22].mxu0 %v354_v12 }
  0x86   :  { %699 = vmatprep.mubr.msk.f32.mxu0 %vm76_vm0, %v357_v13 }
  0x87   :  { %609 = vmatmul.mubr.f32.gmra.mrb[22].mxu1 %v497_v14 }
  0x88   :  { %707 = vmatprep.mubr.msk.f32.mxu1 %vm76_vm0, %v500_v15 }
  0x89   :  { %471 = vmatmul.mubr.f32.gmra.mrb[24].mxu0 %v356_v16 }
  0x8a   :  { %700 = vmatprep.mubr.msk.f32.mxu0 %vm76_vm0, %v359_v17 }
  0x8b   :  { %614 = vmatmul.mubr.f32.gmra.mrb[24].mxu1 %v499_v18 }
  0x8c   :  { %708 = vmatprep.mubr.msk.f32.mxu1 %vm76_vm0, %v502_v19 }
  0x8d   :  { %476 = vmatmul.mubr.f32.gmra.mrb[26].mxu0 %v358_v20 }
  0x8f   :  { %619 = vmatmul.mubr.f32.gmra.mrb[26].mxu1 %v501_v21 }
 0x122   :  { %v168_v22 = vpop.f32.mrb[0].mxu0 }
 0x123   :  { %v170_v23 = vpop.f32.mrb[1].mxu0  ;;  %v304_v24 = vpop.f32.mrb[0].mxu1 }
 0x124   :  { %v338_v25 = vmax.f32 %v168_v22, %v304_v24  ;;  %v306_v26 = vpop.f32.mrb[1].mxu1 }
 0x126   :  { %v173_v27 = vpop.f32.mrb[2].mxu0 }
 0x127   :  { %v175_v28 = vpop.f32.mrb[3].mxu0 }
 0x128   :  { %v309_v29 = vpop.f32.mrb[2].mxu1 }
 0x129   :  { %v339_v30 = vmax.f32 %v173_v27, %v309_v29  ;;  %v311_v31 = vpop.f32.mrb[3].mxu1 }
 0x12a   :  { %v178_v32 = vpop.f32.mrb[4].mxu0 }
 0x12b   :  { %v180_v33 = vpop.f32.mrb[5].mxu0 }
 0x12c   :  { %v314_v34 = vpop.f32.mrb[4].mxu1 }
 0x12d   :  { %v340_v35 = vmax.f32 %v178_v32, %v314_v34  ;;  %v316_v36 = vpop.f32.mrb[5].mxu1 }
 0x12e   :  { %v183_v37 = vpop.f32.mrb[6].mxu0 }
 0x12f   :  { %v185_v38 = vpop.f32.mrb[7].mxu0 }
 0x130   :  { %v319_v39 = vpop.f32.mrb[6].mxu1 }
 0x131   :  { %v341_v40 = vmax.f32 %v183_v37, %v319_v39  ;;  %v321_v41 = vpop.f32.mrb[7].mxu1 }
 0x132   :  { %v188_v42 = vpop.f32.mrb[8].mxu0 }
 0x133   :  { %v190_v43 = vpop.f32.mrb[9].mxu0 }
 0x134   :  { %v324_v44 = vpop.f32.mrb[8].mxu1 }
 0x135   :  { %v342_v45 = vmax.f32 %v188_v42, %v324_v44  ;;  %v326_v46 = vpop.f32.mrb[9].mxu1 }
 0x136   :  { %v193_v47 = vpop.f32.mrb[10].mxu0 }
 0x137   :  { %v195_v48 = vpop.f32.mrb[11].mxu0 }
 0x138   :  { %v329_v49 = vpop.f32.mrb[10].mxu1 }
 0x139   :  { %v343_v50 = vmax.f32 %v193_v47, %v329_v49  ;;  %v331_v51 = vpop.f32.mrb[11].mxu1 }
 0x13a   :  { %v198_v52 = vpop.f32.mrb[12].mxu0 }
 0x13b   :  { %v200_v53 = vpop.f32.mrb[13].mxu0 }
 0x13c   :  { %v334_v54 = vpop.f32.mrb[12].mxu1 }
 0x13d   :  { %v344_v55 = vmax.f32 %v198_v52, %v334_v54  ;;  %v336_v56 = vpop.f32.mrb[13].mxu1 }
 0x148   :  { %v447_v57 = vpop.f32.mrb[14].mxu0 }
 0x149   :  { %v481_v58 = vmax.f32 %v338_v25, %v447_v57  ;;  %v449_v59 = vpop.f32.mrb[15].mxu0 }
 0x14a   :  { %v590_v60 = vpop.f32.mrb[14].mxu1 }
 0x14b   :  { %v624_v62 = vmax.f32 %v481_v58, %v590_v60  ;;  %v592_v63 = vpop.f32.mrb[15].mxu1 }
 0x14c   :  { %v452_v0 = vpop.f32.mrb[16].mxu0 }
 0x14d   :  { %v638_v1 = vadd.f32 %v709_v61, %v624_v62  ;;  %v482_v2 = vmax.f32 %v339_v30, %v452_v0  ;;  %v454_v3 = vpop.f32.mrb[17].mxu0 }
 0x14e   :  { %v595_v4 = vpop.f32.mrb[16].mxu1 }
 0x14f   :  { %v645_v5 = vmax.f32 %v638_v1, 0.0  ;;  %v625_v6 = vmax.f32 %v482_v2, %v595_v4  ;;  %v597_v7 = vpop.f32.mrb[17].mxu1 }
 0x150   :  { %v457_v8 = vpop.f32.mrb[18].mxu0 }
 0x151   :  { %652 = vst [vmem:[#allocation7] sm:$0xff] %v645_v5  ;;  %v639_v9 = vadd.f32 %v709_v61, %v625_v6  ;;  %v483_v10 = vmax.f32 %v340_v35, %v457_v8  ;;  %v459_v11 = vpop.f32.mrb[19].mxu0 }
 0x152   :  { %v600_v12 = vpop.f32.mrb[18].mxu1 }
 0x153   :  { %v646_v13 = vmax.f32 %v639_v9, 0.0  ;;  %v626_v14 = vmax.f32 %v483_v10, %v600_v12  ;;  %v602_v15 = vpop.f32.mrb[19].mxu1 }
 0x154   :  { %v462_v16 = vpop.f32.mrb[20].mxu0 }
 0x155   :  { %653 = vst [vmem:[#allocation7 + $0x8] sm:$0xff] %v646_v13  ;;  %v640_v17 = vadd.f32 %v709_v61, %v626_v14  ;;  %v484_v18 = vmax.f32 %v341_v40, %v462_v16  ;;  %v464_v19 = vpop.f32.mrb[21].mxu0 }
 0x156   :  { %v605_v20 = vpop.f32.mrb[20].mxu1 }
 0x157   :  { %v647_v21 = vmax.f32 %v640_v17, 0.0  ;;  %v627_v22 = vmax.f32 %v484_v18, %v605_v20  ;;  %v607_v23 = vpop.f32.mrb[21].mxu1 }
 0x158   :  { %v467_v24 = vpop.f32.mrb[22].mxu0 }
 0x159   :  { %654 = vst [vmem:[#allocation7 + $0x10] sm:$0xff] %v647_v21  ;;  %v641_v25 = vadd.f32 %v709_v61, %v627_v22  ;;  %v485_v26 = vmax.f32 %v342_v45, %v467_v24  ;;  %v469_v27 = vpop.f32.mrb[23].mxu0 }
 0x15a   :  { %v610_v28 = vpop.f32.mrb[22].mxu1 }
 0x15b   :  { %v648_v29 = vmax.f32 %v641_v25, 0.0  ;;  %v628_v30 = vmax.f32 %v485_v26, %v610_v28  ;;  %v612_v31 = vpop.f32.mrb[23].mxu1 }
 0x15c   :  { %v472_v32 = vpop.f32.mrb[24].mxu0 }
 0x15d   :  { %655 = vst [vmem:[#allocation7 + $0x18] sm:$0xff] %v648_v29  ;;  %v642_v33 = vadd.f32 %v709_v61, %v628_v30  ;;  %v486_v34 = vmax.f32 %v343_v50, %v472_v32  ;;  %v474_v35 = vpop.f32.mrb[25].mxu0 }
 0x15e   :  { %v615_v36 = vpop.f32.mrb[24].mxu1 }
 0x15f   :  { %v649_v37 = vmax.f32 %v642_v33, 0.0  ;;  %v629_v38 = vmax.f32 %v486_v34, %v615_v36  ;;  %v617_v39 = vpop.f32.mrb[25].mxu1 }
 0x160   :  { %v477_v40 = vpop.f32.mrb[26].mxu0 }
 0x161   :  { %656 = vst [vmem:[#allocation7 + $0x20] sm:$0xff] %v649_v37  ;;  %v643_v41 = vadd.f32 %v709_v61, %v629_v38  ;;  %v487_v42 = vmax.f32 %v344_v55, %v477_v40  ;;  %v479_v43 = vpop.f32.mrb[27].mxu0 }
 0x162   :  { %v620_v44 = vpop.f32.mrb[26].mxu1 }
 0x163   :  { %v650_v45 = vmax.f32 %v643_v41, 0.0  ;;  %v630_v46 = vmax.f32 %v487_v42, %v620_v44  ;;  %v622_v47 = vpop.f32.mrb[27].mxu1 }
 0x165   :  { %657 = vst [vmem:[#allocation7 + $0x28] sm:$0xff] %v650_v45  ;;  %v644_v48 = vadd.f32 %v709_v61, %v630_v46 }
 0x167   :  { %v651_v49 = vmax.f32 %v644_v48, 0.0 }
 0x169   :  { %658 = vst [vmem:[#allocation7 + $0x30] sm:$0xff] %v651_v49 }
 0x16a   :  { %882 = shalt.err (!%p879_p6)
}
 0x16b   :  { %s883_s17 = scalar_lea.hbm %s1108_s3, 896 }
 0x16c   :  { %p884_p7 = scmp.ne.s32.totalorder %s1108_s3, %s883_s17  ;;  %p887_p8 = scmp.lt.u32.totalorder %s883_s17, %s1108_s3 }
 0x16e   :  { %p889_p9 = pnand %p887_p8, %p884_p7 }
 0x170   :  { %892 = shalt.err (!%p889_p9)
}
 0x171   :  { %670 = dma.vmem_to_hbm [thread:$0]  %s665_s13, 896, %s1108_s3, [#allocation4], %s903_s0, %s903_s0, %s904_s9  }
 0x172   :  { %897 = dma.done.wait [#allocation4], 896  }
 0x173   :  { %898 = vsyncadd [#allocation4], 4294966400 }
 0x174   :  { %674 = vsyncpa [#allocation3], 1 }
 0x175   :  { %675 = vsyncpa [#allocation6], 1 }
 0x176   :  { %676 = vsyncpa [#allocation4], 1 }

</bundles_post_ra>
